<compile_context>
chip_gen: v5e
topology: v5e:2x2
jax: 0.10.0
libtpu: 0.0.40
codegen_flags: <defaults>
</compile_context>

<pallas_src>
import functools

import jax
import jax.numpy as jnp
from jax import lax
from jax.experimental import pallas as pl
from jax.experimental.pallas import tpu as pltpu


_KDE_CHUNK = 512          # lane-chunk for blocking the KDE over Ntr


def _round_up(x, m):
    return ((x + m - 1) // m) * m


def _vmem_capacity_bytes():
    try:
        info = pltpu.get_tpu_info()
        return int(getattr(info, "vmem_capacity_bytes", 64 * 1024 * 1024))
    except Exception:
        return 64 * 1024 * 1024


def _pick_point_tile(npts, nz, t, samp_bytes, kde_cols, budget):
    """Largest sublane tile (multiple of 8, <= npts) fitting the VMEM budget."""
    if npts <= 8:
        return max(npts, 1)                    # single block == full dim
    upper = (npts // 8) * 8                    # never exceed the array extent
    if npts >= 16:
        # v7x has two TensorCores: keep at least two parallel grid tiles.
        upper = min(upper, _round_up((npts + 1) // 2, 8))
    upper = min(upper, 2048)
    cands, c = [8], 16
    while c <= upper:
        cands.append(c)
        c *= 2
    if upper not in cands:
        cands.append(upper)
    best = 8
    for tile in sorted(cands):
        if tile > upper:
            continue
        need = (2 * nz * tile * t * samp_bytes   # double-buffered sample block
                + 8 * tile * t * 4               # f32 loop carries + temporaries
                + tile * kde_cols * 6            # d2 (f32) + w (bf16)
                + tile * 16 * 4)                 # aug coords + packed output
        if need <= budget:
            best = tile
    return best


# ---------------------------------------------------------------------------
# Shared helper: mean / unbiased std over the leading nz axis of a
# (nz, points_tile, T) sample block.  Shifted accumulation (centered by the
# first sample) in loop-carried f32 vregs — no VMEM accumulators.
# ---------------------------------------------------------------------------
def _mc_mean_std(y_ref, nz):
    y0 = y_ref[0].astype(jnp.float32)          # (tile_p, T)
    zeros = jnp.zeros_like(y0)

    def body(i, carry):
        s, ss = carry
        d = y_ref[i].astype(jnp.float32) - y0
        return s + d, ss + d * d

    s, ss = lax.fori_loop(1, nz, body, (zeros, zeros), unroll=(nz <= 8))
    inv_nz = 1.0 / nz
    mu = y0 + s * inv_nz
    var = jnp.maximum(ss - s * s * inv_nz, 0.0) * (1.0 / max(nz - 1, 1))
    return mu, jnp.sqrt(var)


# ---------------------------------------------------------------------------
# Train-side kernel, gridded over Ntr sublane tiles:
#     res_[i] = mean_T | (train_y - mu_tr) / (sigma_tr + eps) |
# Output packed as (tile_n, 2): col 0 = res_, col 1 = ones, so the query kernel
# gets the KDE numerator AND denominator from a single MXU dot.
# ---------------------------------------------------------------------------
def _train_residual_kernel(ytr_ref, ty_ref, res2_ref, *, nz):
    mu, sigma = _mc_mean_std(ytr_ref, nz)                    # (tile_n, T)
    ty = ty_ref[...].astype(jnp.float32)
    res = jnp.abs(ty - mu) * pl.reciprocal(sigma + 1e-8, approx=True)
    res_mean = jnp.mean(res, axis=1, keepdims=True)          # (tile_n, 1)
    lane = lax.broadcasted_iota(jnp.int32, res2_ref.shape, 1)
    res2_ref[...] = jnp.where(lane == 0, res_mean, 1.0)


# ---------------------------------------------------------------------------
# Query kernel, gridded over Mq sublane tiles:
#   * MC mean / unbiased std over nz samples  -> sigma_x  (tile_m, 1)
#   * KDE residual estimate, blocked over Ntr -> rx       (tile_m, 1)
# Packed output (tile_m, 2): col 0 = rx, col 1 = sigma_x.
# ---------------------------------------------------------------------------
def _query_acq_kernel(yq_ref, xqa_ref, txa_ref, res2_ref, out_ref, *,
                      nz, ntr_chunk):
    # --- MC statistics (loop-carried vreg accumulators) ----------------------
    mu, sigma = _mc_mean_std(yq_ref, nz)                     # (tile_m, T)
    safe_mu = jnp.where(jnp.abs(mu) < 1e-8,
                        jnp.where(mu >= 0.0, 1e-8, -1e-8), mu)
    ratio = sigma * pl.reciprocal(safe_mu, approx=True)      # sigma / mu
    sigma_x = jnp.mean(ratio, axis=1, keepdims=True)         # (tile_m, 1)

    # --- KDE residual estimate, blocked over Ntr ------------------------------
    xqa = xqa_ref[...]                                       # (tile_m, da)
    tile_m = xqa.shape[0]
    ntr_pad = txa_ref.shape[1]

    def kde_chunk(tx_blk, r2_blk):
        # d2[j,i] = || s*xq_j - s*tx_i ||^2 via one augmented contraction.
        d2 = lax.dot_general(xqa, tx_blk, (((1,), (0,)), ((), ())),
                             preferred_element_type=jnp.float32)
        # exp in f32 (v5e has no bf16 EUP); bf16 for the second MXU dot.
        w = jnp.exp(-jnp.maximum(d2, 0.0)).astype(jnp.bfloat16)
        return lax.dot_general(w, r2_blk.astype(jnp.bfloat16),
                               (((1,), (0,)), ((), ())),
                               preferred_element_type=jnp.float32)

    if ntr_pad <= ntr_chunk:
        nd = kde_chunk(txa_ref[...], res2_ref[...])          # (tile_m, 2)
    else:
        def body(c, acc):
            off = pl.multiple_of(c * ntr_chunk, 128)
            return acc + kde_chunk(txa_ref[:, pl.ds(off, ntr_chunk)],
                                   res2_ref[pl.ds(off, ntr_chunk), :])
        nd = lax.fori_loop(0, ntr_pad // ntr_chunk, body,
                           jnp.zeros((tile_m, 2), jnp.float32))

    rx = nd[:, 0:1] * pl.reciprocal(nd[:, 1:2] + 1e-8, approx=True)
    lane = lax.broadcasted_iota(jnp.int32, out_ref.shape, 1)
    out_ref[...] = jnp.where(lane == 0, rx, sigma_x)


# ---------------------------------------------------------------------------
# Wrapper reproducing XGBUncertainity.forward given the MC sample tensors
# (producer-native layouts, no host-side transform of the big tensors).
# ---------------------------------------------------------------------------
def xgb_uncertainty_acq(x, train_x, train_y, y_samples_q, y_samples_tr,
                        alpha=0.5):
    """
    Args:
      x:            (nr, nb, dx) query compositions.
      train_x:      (Ntr, dx) training compositions.
      train_y:      (Ntr, T) normalized training spectra.
      y_samples_q:  (nz, nr*nb, T) MC spectrum samples at query points.
      y_samples_tr: (nz, Ntr, T) MC spectrum samples at training points.
    Returns:
      (nr, nb) acquisition values  T1 + T2.
    """
    nr, nb, dx = x.shape
    mq = nr * nb
    ntr, t = train_y.shape
    nz_q = int(y_samples_q.shape[0])
    nz_t = int(y_samples_tr.shape[0])

    xq = x.reshape(mq, dx).astype(jnp.float32)
    train_x = train_x.astype(jnp.float32)
    train_y = train_y.astype(jnp.float32)
    # MC samples stay in their producer layout / dtype: (nz, points, T).
    y_samples_q = y_samples_q.reshape(nz_q, mq, t)
    y_samples_tr = y_samples_tr.reshape(nz_t, ntr, t)
    samp_q_bytes = jnp.dtype(y_samples_q.dtype).itemsize
    samp_t_bytes = jnp.dtype(y_samples_tr.dtype).itemsize

    vmem_cap = _vmem_capacity_bytes()
    budget = vmem_cap // 2                       # >=25% headroom on every chip
    vmem_limit = int(vmem_cap * 3 // 4)

    # ---- train-side residuals (gridded over Ntr sublane tiles) ---------------
    tile_n = _pick_point_tile(ntr, nz_t, t, samp_t_bytes, 0, budget)
    grid_n = pl.cdiv(ntr, tile_n)
    ce_tr = pl.CostEstimate(
        flops=6 * nz_t * ntr * t + 10 * ntr * t,
        transcendentals=2 * ntr * t,
        bytes_accessed=nz_t * ntr * t * samp_t_bytes + ntr * t * 4 + ntr * 8)
    res2 = pl.pallas_call(
        functools.partial(_train_residual_kernel, nz=nz_t),
        out_shape=jax.ShapeDtypeStruct((ntr, 2), jnp.float32),
        grid_spec=pltpu.PrefetchScalarGridSpec(
            num_scalar_prefetch=0,
            grid=(grid_n,),
            in_specs=[pl.BlockSpec((nz_t, tile_n, t), lambda i: (0, i, 0)),
                      pl.BlockSpec((tile_n, t), lambda i: (i, 0))],
            out_specs=pl.BlockSpec((tile_n, 2), lambda i: (i, 0))),
        compiler_params=pltpu.CompilerParams(
            dimension_semantics=("parallel",),
            vmem_limit_bytes=vmem_limit),
        cost_estimate=ce_tr,
    )(y_samples_tr, train_y)

    # ---- Scott bandwidth, folded into the coordinates (tiny wrapper JAX) -----
    ddof = 1 if ntr > 1 else 0
    std_x = jnp.std(train_x, axis=0, ddof=ddof)
    bw = jnp.mean(std_x) * (float(ntr) ** (-1.0 / (dx + 4)))
    scale = 1.0 / (jnp.sqrt(2.0) * bw + 1e-30)   # ||s*a - s*b||^2 == d2/(2 bw^2)
    txs = train_x * scale                        # (Ntr, dx)
    xqs = xq * scale                             # (Mq, dx)
    da = dx + 2
    xq_aug = jnp.concatenate(
        [xqs,
         jnp.sum(xqs * xqs, axis=1, keepdims=True),
         jnp.ones((mq, 1), jnp.float32)], axis=1)                     # (Mq, da)
    tx_aug = jnp.concatenate(
        [-2.0 * txs,
         jnp.ones((ntr, 1), jnp.float32),
         jnp.sum(txs * txs, axis=1, keepdims=True)], axis=1).T        # (da, Ntr)

    # Pad the (tiny) train-side tensors so the in-kernel Ntr chunk loop is even;
    # padded rows of res2 are zero -> they contribute nothing to the KDE sums.
    ntr_pad = ntr if ntr <= _KDE_CHUNK else _round_up(ntr, _KDE_CHUNK)
    if ntr_pad != ntr:
        tx_aug = jnp.pad(tx_aug, ((0, 0), (0, ntr_pad - ntr)))
        res2_kde = jnp.pad(res2, ((0, ntr_pad - ntr), (0, 0)))
    else:
        res2_kde = res2

    # ---- query kernel (gridded over Mq sublane tiles) -------------------------
    tile_m = _pick_point_tile(mq, nz_q, t, samp_q_bytes,
                              min(ntr_pad, _KDE_CHUNK), budget)
    grid_m = pl.cdiv(mq, tile_m)
    ce_q = pl.CostEstimate(
        flops=(6 * nz_q * t * mq + 10 * t * mq
               + 2 * da * ntr_pad * mq + 8 * ntr_pad * mq),
        transcendentals=ntr_pad * mq + 2 * t * mq + 2 * mq,
        bytes_accessed=(nz_q * mq * t * samp_q_bytes + mq * da * 4
                        + ntr_pad * (da + 2) * 4 + mq * 8))
    out = pl.pallas_call(
        functools.partial(_query_acq_kernel, nz=nz_q, ntr_chunk=_KDE_CHUNK),
        out_shape=jax.ShapeDtypeStruct((mq, 2), jnp.float32),
        grid_spec=pltpu.PrefetchScalarGridSpec(
            num_scalar_prefetch=0,
            grid=(grid_m,),
            in_specs=[pl.BlockSpec((nz_q, tile_m, t), lambda i: (0, i, 0)),
                      pl.BlockSpec((tile_m, da), lambda i: (i, 0)),
                      pl.BlockSpec((da, ntr_pad), lambda i: (0, 0)),
                      pl.BlockSpec((ntr_pad, 2), lambda i: (0, 0))],
            out_specs=pl.BlockSpec((tile_m, 2), lambda i: (i, 0))),
        compiler_params=pltpu.CompilerParams(
            dimension_semantics=("parallel",),
            vmem_limit_bytes=vmem_limit),
        cost_estimate=ce_q,
    )(y_samples_q, xq_aug, tx_aug, res2_kde)

    rx = out[:, 0]
    sigma_x = out[:, 1]

    # Global min-max normalisation + alpha blend: needs a reduction over ALL Mq,
    # so it lives outside the tiled kernel (trivial O(nr*nb) XLA work).
    def _min_max(v):
        return (v - jnp.min(v)) / (jnp.max(v) - jnp.min(v) + 1e-8)

    acq = alpha * _min_max(rx) + (1.0 - alpha) * _min_max(sigma_x)
    return acq.reshape(nr, nb)


if __name__ == "__main__":
    key = jax.random.PRNGKey(0)
    k1, k2, k3, k4, k5 = jax.random.split(key, 5)

    # Small, deterministic synthetic problem (exercises ragged last tiles and
    # the 2-tile parallel grid path).
    nr, nb, dx = 2, 9, 3      # num_restarts, batch, input_dim (len(bounds))
    ntr = 10                  # number of training compositions
    T = 16                    # len(expt.t): spectrum length
    nz = 8                    # num_z_sample (MC samples)

    x = jax.random.uniform(k1, (nr, nb, dx), dtype=jnp.float32)
    train_x = jax.random.uniform(k2, (ntr, dx), dtype=jnp.float32)
    train_y = jax.random.uniform(k3, (ntr, T), dtype=jnp.float32)
    # Synthetic MC decoder outputs (kept positive so sigma/mu is well behaved).
    y_samples_q = 0.5 + jax.random.uniform(k4, (nz, nr * nb, T), dtype=jnp.float32)
    y_samples_tr = 0.5 + jax.random.uniform(k5, (nz, ntr, T), dtype=jnp.float32)

    out = xgb_uncertainty_acq(x, train_x, train_y, y_samples_q, y_samples_tr,
                              alpha=0.5)
    out = jax.block_until_ready(out)
    assert out.shape == (nr, nb)
    assert bool(jnp.all(jnp.isfinite(out)))
    print("KERNEL_OK")
</pallas_src>

<mosaic_0001>
module attributes {stable_mosaic.version = 11 : i64} {
  func.func @_train_residual_kernel(%arg0: i32, %arg1: memref<8x8x16xf32, #tpu.memory_space<vmem>>, %arg2: memref<8x16xf32, #tpu.memory_space<vmem>>, %arg3: memref<8x2xf32, #tpu.memory_space<vmem>>) attributes {dimension_semantics = [#tpu.dimension_semantics<parallel>], iteration_bounds = array<i64: 2>, scalar_prefetch = 0 : i64, scratch_operands = 0 : i64, tpu.core_type = #tpu.core_type<tc>, window_params = [{transform_indices = @transform_0, window_bounds = array<i64: 8, 8, 16>}, {transform_indices = @transform_1, window_bounds = array<i64: 8, 16>}, {transform_indices = @transform_2, window_bounds = array<i64: 8, 2>}]} {
    %c0 = arith.constant 0 : index
    %c0_0 = arith.constant 0 : index
    %c0_1 = arith.constant 0 : index
    %0 = vector.load %arg1[%c0, %c0_0, %c0_1] : memref<8x8x16xf32, #tpu.memory_space<vmem>>, vector<1x8x16xf32>
    %1 = vector.shape_cast %0 : vector<1x8x16xf32> to vector<8x16xf32>
    %cst = arith.constant 0.000000e+00 : f32
    %2 = vector.broadcast %cst : f32 to vector<8x16xf32>
    %c1_i32 = arith.constant 1 : i32
    %3 = arith.index_cast %c1_i32 : i32 to index
    %c0_2 = arith.constant 0 : index
    %c0_3 = arith.constant 0 : index
    %4 = vector.load %arg1[%3, %c0_2, %c0_3] : memref<8x8x16xf32, #tpu.memory_space<vmem>>, vector<1x8x16xf32>
    %5 = vector.shape_cast %4 : vector<1x8x16xf32> to vector<8x16xf32>
    %6 = arith.subf %5, %1 : vector<8x16xf32>
    %7 = arith.addf %2, %6 : vector<8x16xf32>
    %8 = arith.mulf %6, %6 : vector<8x16xf32>
    %9 = arith.addf %2, %8 : vector<8x16xf32>
    %c2_i32 = arith.constant 2 : i32
    %10 = arith.index_cast %c2_i32 : i32 to index
    %c0_4 = arith.constant 0 : index
    %c0_5 = arith.constant 0 : index
    %11 = vector.load %arg1[%10, %c0_4, %c0_5] : memref<8x8x16xf32, #tpu.memory_space<vmem>>, vector<1x8x16xf32>
    %12 = vector.shape_cast %11 : vector<1x8x16xf32> to vector<8x16xf32>
    %13 = arith.subf %12, %1 : vector<8x16xf32>
    %14 = arith.addf %7, %13 : vector<8x16xf32>
    %15 = arith.mulf %13, %13 : vector<8x16xf32>
    %16 = arith.addf %9, %15 : vector<8x16xf32>
    %c3_i32 = arith.constant 3 : i32
    %17 = arith.index_cast %c3_i32 : i32 to index
    %c0_6 = arith.constant 0 : index
    %c0_7 = arith.constant 0 : index
    %18 = vector.load %arg1[%17, %c0_6, %c0_7] : memref<8x8x16xf32, #tpu.memory_space<vmem>>, vector<1x8x16xf32>
    %19 = vector.shape_cast %18 : vector<1x8x16xf32> to vector<8x16xf32>
    %20 = arith.subf %19, %1 : vector<8x16xf32>
    %21 = arith.addf %14, %20 : vector<8x16xf32>
    %22 = arith.mulf %20, %20 : vector<8x16xf32>
    %23 = arith.addf %16, %22 : vector<8x16xf32>
    %c4_i32 = arith.constant 4 : i32
    %24 = arith.index_cast %c4_i32 : i32 to index
    %c0_8 = arith.constant 0 : index
    %c0_9 = arith.constant 0 : index
    %25 = vector.load %arg1[%24, %c0_8, %c0_9] : memref<8x8x16xf32, #tpu.memory_space<vmem>>, vector<1x8x16xf32>
    %26 = vector.shape_cast %25 : vector<1x8x16xf32> to vector<8x16xf32>
    %27 = arith.subf %26, %1 : vector<8x16xf32>
    %28 = arith.addf %21, %27 : vector<8x16xf32>
    %29 = arith.mulf %27, %27 : vector<8x16xf32>
    %30 = arith.addf %23, %29 : vector<8x16xf32>
    %c5_i32 = arith.constant 5 : i32
    %31 = arith.index_cast %c5_i32 : i32 to index
    %c0_10 = arith.constant 0 : index
    %c0_11 = arith.constant 0 : index
    %32 = vector.load %arg1[%31, %c0_10, %c0_11] : memref<8x8x16xf32, #tpu.memory_space<vmem>>, vector<1x8x16xf32>
    %33 = vector.shape_cast %32 : vector<1x8x16xf32> to vector<8x16xf32>
    %34 = arith.subf %33, %1 : vector<8x16xf32>
    %35 = arith.addf %28, %34 : vector<8x16xf32>
    %36 = arith.mulf %34, %34 : vector<8x16xf32>
    %37 = arith.addf %30, %36 : vector<8x16xf32>
    %c6_i32 = arith.constant 6 : i32
    %38 = arith.index_cast %c6_i32 : i32 to index
    %c0_12 = arith.constant 0 : index
    %c0_13 = arith.constant 0 : index
    %39 = vector.load %arg1[%38, %c0_12, %c0_13] : memref<8x8x16xf32, #tpu.memory_space<vmem>>, vector<1x8x16xf32>
    %40 = vector.shape_cast %39 : vector<1x8x16xf32> to vector<8x16xf32>
    %41 = arith.subf %40, %1 : vector<8x16xf32>
    %42 = arith.addf %35, %41 : vector<8x16xf32>
    %43 = arith.mulf %41, %41 : vector<8x16xf32>
    %44 = arith.addf %37, %43 : vector<8x16xf32>
    %c7_i32 = arith.constant 7 : i32
    %45 = arith.index_cast %c7_i32 : i32 to index
    %c0_14 = arith.constant 0 : index
    %c0_15 = arith.constant 0 : index
    %46 = vector.load %arg1[%45, %c0_14, %c0_15] : memref<8x8x16xf32, #tpu.memory_space<vmem>>, vector<1x8x16xf32>
    %47 = vector.shape_cast %46 : vector<1x8x16xf32> to vector<8x16xf32>
    %48 = arith.subf %47, %1 : vector<8x16xf32>
    %49 = arith.addf %42, %48 : vector<8x16xf32>
    %50 = arith.mulf %48, %48 : vector<8x16xf32>
    %51 = arith.addf %44, %50 : vector<8x16xf32>
    %c7_i32_16 = arith.constant 7 : i32
    %cst_17 = arith.constant 1.250000e-01 : f32
    %52 = vector.broadcast %cst_17 : f32 to vector<8x16xf32>
    %53 = arith.mulf %49, %52 : vector<8x16xf32>
    %54 = arith.addf %1, %53 : vector<8x16xf32>
    %55 = arith.mulf %49, %49 : vector<8x16xf32>
    %cst_18 = arith.constant 1.250000e-01 : f32
    %56 = vector.broadcast %cst_18 : f32 to vector<8x16xf32>
    %57 = arith.mulf %55, %56 : vector<8x16xf32>
    %58 = arith.subf %51, %57 : vector<8x16xf32>
    %cst_19 = arith.constant 0.000000e+00 : f32
    %59 = vector.broadcast %cst_19 : f32 to vector<8x16xf32>
    %60 = arith.maximumf %58, %59 : vector<8x16xf32>
    %cst_20 = arith.constant 0.142857149 : f32
    %61 = vector.broadcast %cst_20 : f32 to vector<8x16xf32>
    %62 = arith.mulf %60, %61 : vector<8x16xf32>
    %63 = math.sqrt %62 : vector<8x16xf32>
    %c0_21 = arith.constant 0 : index
    %c0_22 = arith.constant 0 : index
    %64 = vector.load %arg2[%c0_21, %c0_22] : memref<8x16xf32, #tpu.memory_space<vmem>>, vector<8x16xf32>
    %65 = arith.subf %64, %54 : vector<8x16xf32>
    %66 = math.absf %65 : vector<8x16xf32>
    %cst_23 = arith.constant 9.99999993E-9 : f32
    %67 = vector.broadcast %cst_23 : f32 to vector<8x16xf32>
    %68 = arith.addf %63, %67 : vector<8x16xf32>
    %69 = tpu.reciprocal %68 {approx = true} : vector<8x16xf32> -> vector<8x16xf32>
    %70 = arith.mulf %66, %69 : vector<8x16xf32>
    %cst_24 = arith.constant dense<0.000000e+00> : vector<8xf32>
    %71 = vector.multi_reduction <add>, %70, %cst_24 [1] : vector<8x16xf32> to vector<8xf32>
    %72 = vector.shape_cast %71 : vector<8xf32> to vector<8x1xf32>
    %cst_25 = arith.constant 1.600000e+01 : f32
    %73 = vector.broadcast %cst_25 : f32 to vector<8x1xf32>
    %74 = arith.divf %72, %73 : vector<8x1xf32>
    %75 = tpu.iota {dimensions = array<i32: 1>} : vector<8x2xi32>
    %c0_i32 = arith.constant 0 : i32
    %76 = vector.broadcast %c0_i32 : i32 to vector<8x2xi32>
    %77 = arith.cmpi eq, %75, %76 : vector<8x2xi32>
    %cst_26 = arith.constant 1.000000e+00 : f32
    %78 = vector.shape_cast %74 : vector<8x1xf32> to vector<8x1xf32>
    %79 = vector.broadcast %78 : vector<8x1xf32> to vector<8x2xf32>
    %80 = vector.broadcast %cst_26 : f32 to vector<8x2xf32>
    %81 = arith.select %77, %79, %80 : vector<8x2xi1>, vector<8x2xf32>
    %c0_27 = arith.constant 0 : index
    %c0_28 = arith.constant 0 : index
    %82 = vector.load %arg3[%c0_27, %c0_28] : memref<8x2xf32, #tpu.memory_space<vmem>>, vector<8x2xf32>
    tpu.vector_store %arg3[%c0_27, %c0_28], %81 {strides = array<i32>} : memref<8x2xf32, #tpu.memory_space<vmem>>, vector<8x2xf32>,
    return
  }
  func.func @transform_0(%arg0: i32) -> (i32, i32, i32) {
    %c0_i32 = arith.constant 0 : i32
    %c0_i32_0 = arith.constant 0 : i32
    %c0_i32_1 = arith.constant 0 : i32
    return %c0_i32, %arg0, %c0_i32_0 : i32, i32, i32
  }
  func.func @transform_1(%arg0: i32) -> (i32, i32) {
    %c0_i32 = arith.constant 0 : i32
    %c0_i32_0 = arith.constant 0 : i32
    return %arg0, %c0_i32 : i32, i32
  }
  func.func @transform_2(%arg0: i32) -> (i32, i32) {
    %c0_i32 = arith.constant 0 : i32
    %c0_i32_0 = arith.constant 0 : i32
    return %arg0, %c0_i32 : i32, i32
  }
}

</mosaic_0001>

<bundles_post_ra>
// kernel: tpu_custom_call.1
= control target key start
LH: loop header
LB: loop body
LE: loop exit
PB: predicated region body
PF: predicated region fallthrough
CT: control target
= control target key end

     0   :  { %s469_s9 = smov 0   ;;  %s471_s10 = smov 0   ;;  %s533_s0 = inlined_call_operand.vmem [shape: f32[8,10,16], index: 0, kind: input, shape index: {}]   ;;  %s534_s1 = inlined_call_operand.vmem [shape: f32[10,16], index: 1, kind: input, shape index: {}]   ;;  %s535_s2 = inlined_call_operand.vmem [shape: f32[10,2], index: 2, kind: output, shape index: {}]  }
   0x1   :  { %s473_s11 = smov 0  }
   0x2 LB: > { %s379_s12 = sadd.s32 4294967295, %s451_s11   ;;  %s486_s13 = sadd.s32 1, %s451_s11   ;;  %s451_s11 = sphi %s473_s11, %s538_s11   ;;  %s447_s10 = sphi %s471_s10, %s537_s10   ;;  %s443_s9 = sphi %s469_s9, %s536_s9  }
   0x3   : > { %s16_s14 = ssub.s32 %s451_s11, %s486_s13  ;;  %s19_s15 = sadd.s32 1, %s447_s10 }
   0x4   : > { %p17_p0 = scmp.eq.s32.totalorder %s16_s14, 0  ;;  %p26_p1 = scmp.ne.s32.totalorder %s447_s10, %s443_s9 }
   0x5   : > { %p27_p2 = scmp.eq.s32.totalorder %s451_s11, 0  ;;  %p382_p4 = scmp.ge.s32.totalorder %s451_s11, 2 }
   0x6   : > { %s495_s16 = scalar_select %p17_p0, %s447_s10, %s19_s15  }
   0x7   : > { %p28_p3 = por %p27_p2, %p26_p1  ;;  %104 = sbr.rel (%p382_p4) target bundleno = 24 (0x18), region = 16 }
   0xc   : > { %107 = sbr.rel (!%p28_p3) target bundleno = 24 (0x18), region = 20  ;;  %s109_s17 = sand.u32 (%p28_p3), 1, %s447_s10  }
   0xd   : > { %s384_s18 = sshll.u32 (%p28_p3), %s451_s11, 3  ;;  %s383_s19 = sshll.u32 (%p28_p3), %s109_s17, 6 }
   0xe   : > { %s113_s22 = scalar_lea.vmem (%p28_p3), %s533_s0, %s384_s18  ;;  %s111_s23 = scalar_lea.vmem (%p28_p3), [#allocation2], %s383_s19 }
   0xf   : > { %v156_v0 = vld [vmem:[%s113_s22] sm:$0xff] (%p28_p3)  ;;  %v158_v1 = vld [vmem:[%s113_s22 + $0x10] sm:$0xff] (%p28_p3) }
  0x10   : > { %v160_v2 = vld [vmem:[%s113_s22 + $0x20] sm:$0xff] (%p28_p3)  ;;  %157 = vst [vmem:[%s111_s23] sm:$0xff] (%p28_p3), %v156_v0  ;;  %v162_v3 = vld [vmem:[%s113_s22 + $0x30] sm:$0xff] (%p28_p3) }
  0x11   : > { %159 = vst [vmem:[%s111_s23 + $0x8] sm:$0xff] %v158_v1  ;;  %v164_v4 = vld [vmem:[%s113_s22 + $0x40] sm:$0xff]  ;;  %v166_v5 = vld [vmem:[%s113_s22 + $0x50] sm:$0xff] }
  0x12   : > { %161 = vst [vmem:[%s111_s23 + $0x10] sm:$0xff] %v160_v2  ;;  %v168_v6 = vld [vmem:[%s113_s22 + $0x60] sm:$0xff]  ;;  %v170_v7 = vld [vmem:[%s113_s22 + $0x70] sm:$0xff] }
  0x13   : > { %163 = vst [vmem:[%s111_s23 + $0x18] sm:$0xff] %v162_v3 }
  0x14   : > { %165 = vst [vmem:[%s111_s23 + $0x20] sm:$0xff] %v164_v4 }
  0x15   : > { %167 = vst [vmem:[%s111_s23 + $0x28] sm:$0xff] %v166_v5 }
  0x16   : > { %169 = vst [vmem:[%s111_s23 + $0x30] sm:$0xff] %v168_v6 }
  0x17   : > { %171 = vst [vmem:[%s111_s23 + $0x38] sm:$0xff] %v170_v7 }
  0x18 PF: > { %p385_p5 = scmp.ge.s32.totalorder %s451_s11, 1  ;;  %p183_p6 = scmp.lt.s32.totalorder %s451_s11, 3 }
  0x1a   : > { %p184_p7 = pnand %p385_p5, %p183_p6 }
  0x1b   : > { %s190_s24 = sand.u32 (!%p184_p7), 1, %s443_s9   ;;  %p214_p8 = scmp.lt.s32.totalorder (!%p184_p7), %s379_s12, 1 }
  0x1c   : > { %187 = sbr.rel (%p184_p7) target bundleno = 211 (0xd3), region = 62  ;;  %s386_s25 = sshll.u32 (!%p184_p7), %s190_s24, 6 }
  0x1d   : > { %s192_s26 = scalar_lea.vmem (!%p184_p7), [#allocation2], %s386_s25 }
  0x21   : > { %v222_v8 = vld [vmem:[%s192_s26] sm:$0xff]  ;;  %v389_v9 = vld [vmem:[%s192_s26 + $0x8] sm:$0xff]  ;;  %v390_v10 = vld [vmem:[%s192_s26 + $0x10] sm:$0xff]  ;;  %s540_s12 = smov (!%p214_p8, %s379_s12), 1  ;;  %vm290_vm2 = vcmask 130048   ;;  %v453_v2 = vmov 16.0   ;;  %v302_v7 = vlaneseq }
  0x22   : > { %v225_v11 = vsub.f32 %v389_v9, %v222_v8  ;;  %v231_v12 = vsub.f32 %v390_v10, %v222_v8  ;;  %v391_v13 = vld [vmem:[%s192_s26 + $0x18] sm:$0xff]  ;;  %v392_v14 = vld [vmem:[%s192_s26 + $0x20] sm:$0xff]  ;;  %v393_v16 = vld [vmem:[%s192_s26 + $0x28] sm:$0xff]  ;;  %s387_s27 = sshll.u32 %s540_s12, 3  ;;  %vm306_vm5 = vcmask 15360  }
  0x23   : > { %v237_v15 = vsub.f32 %v391_v13, %v222_v8  ;;  %v243_v20 = vsub.f32 %v392_v14, %v222_v8  ;;  %v394_v22 = vld [vmem:[%s192_s26 + $0x30] sm:$0xff]  ;;  %v249_v26 = vsub.f32 %v393_v16, %v222_v8  ;;  %v395_v27 = vld [vmem:[%s192_s26 + $0x38] sm:$0xff]  ;;  %s217_s30 = scalar_lea.vmem %s534_s1, %s387_s27  ;;  %v303_v9 = vand.u32 127, %v302_v7  ;;  %s221_s5 = scalar_lea.vmem %s535_s2, %s387_s27 }
  0x24   : > { %v227_v17 = vmul.f32 %v225_v11, %v225_v11  ;;  %v232_v18 = vadd.f32 %v231_v12, %v225_v11  ;;  %v233_v19 = vmul.f32 %v231_v12, %v231_v12  ;;  %v255_v31 = vsub.f32 %v394_v22, %v222_v8  ;;  %v284_v58 = vld [vmem:[%s217_s30] sm:$0xff] }
  0x25   : > { %v239_v21 = vmul.f32 %v237_v15, %v237_v15  ;;  %v245_v25 = vmul.f32 %v243_v20, %v243_v20  ;;  %v251_v30 = vmul.f32 %v249_v26, %v249_v26  ;;  %v261_v35 = vsub.f32 %v395_v27, %v222_v8 }
  0x26   : > { %v234_v23 = vadd.f32 %v233_v19, %v227_v17  ;;  %v238_v24 = vadd.f32 %v237_v15, %v232_v18  ;;  %v257_v34 = vmul.f32 %v255_v31, %v255_v31  ;;  %vm304_vm4 = vcmp.eq.s32.totalorder %v303_v9, 0 }
  0x27   : > { %v263_v38 = vmul.f32 %v261_v35, %v261_v35 }
  0x28   : > { %v240_v28 = vadd.f32 %v239_v21, %v234_v23  ;;  %v244_v29 = vadd.f32 %v243_v20, %v238_v24 }
  0x2a   : > { %v246_v32 = vadd.f32 %v245_v25, %v240_v28  ;;  %v250_v33 = vadd.f32 %v249_v26, %v244_v29 }
  0x2c   : > { %v252_v36 = vadd.f32 %v251_v30, %v246_v32  ;;  %v256_v37 = vadd.f32 %v255_v31, %v250_v33 }
  0x2e   : > { %v258_v39 = vadd.f32 %v257_v34, %v252_v36  ;;  %v262_v40 = vadd.f32 %v261_v35, %v256_v37 }
  0x30   : > { %v264_v41 = vadd.f32 %v263_v38, %v258_v39  ;;  %v267_v42 = vmul.f32 %v262_v40, %v262_v40  ;;  %v265_v52 = vmul.f32 0.125, %v262_v40 }
  0x32   : > { %v268_v43 = vmul.f32 0.125, %v267_v42  ;;  %v266_v56 = vadd.f32 %v265_v52, %v222_v8 }
  0x34   : > { %v269_v44 = vsub.f32 %v264_v41, %v268_v43  ;;  %v285_v61 = vsub.f32 %v284_v58, %v266_v56 }
  0x36   : > { %v270_v45 = vmax.f32 %v269_v44, 0.0  ;;  %v286_v62 = vand.u32 2147483647, %v285_v61 }
  0x38   : > { %v271_v46 = vmul.f32 0.14285715, %v270_v45 }
  0x3a   : > { %423 = vrsqrt.f32 %v271_v46  ;;  %vm279_vm0 = vcmp.eq.f32.partialorder %v271_v46, inf  ;;  %v282_v54 = vand.u32 2147483648, %v271_v46  ;;  %vm281_vm1 = vcmp.eq.f32.partialorder %v271_v46, 0.0 }
  0x40   : > { %v424_v47 = vpop.eup %423 }
  0x41   : > { %v273_v48 = vmul.f32 %v424_v47, %v271_v46 }
  0x43   : > { %v274_v49 = vmul.f32 %v424_v47, %v273_v48 }
  0x45   : > { %v275_v50 = vmul.f32 0.5, %v274_v49 }
  0x47   : > { %v276_v51 = vsub.f32 1.5, %v275_v50 }
  0x49   : > { %v277_v53 = vmul.f32 %v424_v47, %v276_v51 }
  0x4b   : > { %v278_v55 = vmul.f32 %v277_v53, %v271_v46 }
  0x4d   : > { %v280_v57 = vsel %vm279_vm0, %v271_v46, %v278_v55 }
  0x4e   : > { %v283_v59 = vsel %vm281_vm1, %v282_v54, %v280_v57 }
  0x4f   : > { %v287_v60 = vadd.f32 1e-08, %v283_v59 }
  0x51   : > { %425 = vrcp.f32 %v287_v60 }
  0x52   : > { %427 = vrcp.f32 %v453_v2 }
  0x57   : > { %v426_v63 = vpop.eup %425 }
  0x58   : > { %v289_v0 = vmul.f32 %v426_v63, %v286_v62  ;;  %v428_v3 = vpop.eup %427 }
  0x59   : > { %v295_v4 = vmul.f32 16.0, %v428_v3  ;;  %vm299_vm3 = vweird.f32 %v428_v3 }
  0x5a   : > { %v291_v1 = vsel %vm290_vm2, %v289_v0, 0.0 }
  0x5b   : > { %292 = vadd.xlane.f32.xlu0 %v291_v1  ;;  %v296_v5 = vsub.f32 1.0, %v295_v4 }
  0x5d   : > { %v297_v6 = vmul.f32 %v428_v3, %v296_v5 }
  0x5f   : > { %v298_v8 = vadd.f32 %v428_v3, %v297_v6 }
  0x61   : > { %v300_v10 = vsel %vm299_vm3, %v428_v3, %v298_v8 }
  0xce   : > { %v293_v11 = vpop.xlane.xlu0 %292 }
  0xcf   : > { %v301_v12 = vmul.f32 %v300_v10, %v293_v11 }
  0xd1   : > { %v305_v13 = vsel %vm304_vm4, %v301_v12, 1.0 }
  0xd2   : > { %307 = vst.msk [vmem:[%s221_s5] sm:$0xff] %vm306_vm5, %v305_v13 }
  0xd3 PF: > { %p9_p9 = scmp.ge.s32.totalorder %s486_s13, 4   ;;  %s536_s9 = smov %s447_s10 }
  0xd4   : > { %s537_s10 = smov %s495_s16  ;;  %s538_s11 = smov %s486_s13 }
  0xd5   :  { %11 = sbr.rel (!%p9_p9) target bundleno = 2 (0x2), region = 111 }

</bundles_post_ra>
